<compile_context>
chip_gen: v7x
topology: tpu7x:2x2x1
jax: 0.10.0
libtpu: 0.0.40
codegen_flags: <defaults>
</compile_context>

<pallas_src>
import functools

import jax
import jax.numpy as jnp
from jax.experimental import pallas as pl
from jax.experimental.pallas import tpu as pltpu

HIDDEN = 128  # hidden width of the DQN MLP (fixed by the PyTorch module)


def dqn_kernel(x_ref, w_ref, b_ref, o_ref, *, n_obs):
    """Fused 3-layer MLP on one batch tile.

    x_ref: (TB, n_obs)  f32   -- raw observations (no padding / pre-cast)
    w_ref: (384, 128)   bf16  -- [w1_pad ; w2 ; w3_pad] stacked on rows
    b_ref: (3, 128)     f32   -- rows = b1, b2, b3_pad
    o_ref: (TB, 128)    f32   -- lane-dense output (cols >= n_actions unused)
    """
    x = x_ref[...]                                     # (TB, n_obs) f32

    # Static, sublane-aligned views into the packed weight slab (free).
    w1 = w_ref[0:n_obs, :].astype(jnp.float32)         # (n_obs, 128)
    w2 = w_ref[1 * HIDDEN:2 * HIDDEN, :]               # (128, 128) bf16
    w3 = w_ref[2 * HIDDEN:3 * HIDDEN, :]               # (128, 128) bf16
    b1 = b_ref[0:1, :]
    b2 = b_ref[1:2, :]
    b3 = b_ref[2:3, :]

    # layer1 + ReLU: n_obs is tiny (4 for CartPole) -> a handful of VPU
    # broadcast-FMAs beats feeding a mostly-empty operand to the MXU and lets
    # us skip the padded-input HBM round trip entirely.
    h1 = b1 + x[:, 0:1] * w1[0:1, :]
    for k in range(1, n_obs):                          # static unroll
        h1 = h1 + x[:, k:k + 1] * w1[k:k + 1, :]
    h1 = jnp.maximum(h1, 0.0).astype(jnp.bfloat16)

    # layer2 + ReLU  (bf16 MXU, f32 accumulate)
    h2 = jnp.dot(h1, w2, preferred_element_type=jnp.float32) + b2
    h2 = jnp.maximum(h2, 0.0).astype(jnp.bfloat16)

    # layer3 (no activation), lane-dense f32 store
    o_ref[...] = jnp.dot(h2, w3, preferred_element_type=jnp.float32) + b3


def pack_params(params, n_observations, n_actions, hidden=HIDDEN):
    """Pack / pad / cast the per-layer params into the kernel operand layout."""
    assert n_observations <= hidden and n_actions <= hidden
    # w1: (n_obs, 128) -> zero-pad rows to (128, 128) so the slab is rectangular
    w1 = jnp.zeros((hidden, hidden), jnp.float32).at[:n_observations, :].set(params["w1"])
    # w3: (128, n_actions) -> zero-pad cols to (128, 128)
    w3 = jnp.zeros((hidden, hidden), jnp.float32).at[:, :n_actions].set(params["w3"])
    w_packed = jnp.concatenate([w1, params["w2"], w3], axis=0).astype(jnp.bfloat16)  # (384,128)

    b3 = jnp.zeros((1, hidden), jnp.float32).at[:, :n_actions].set(params["b3"])
    b_packed = jnp.concatenate([params["b1"], params["b2"], b3], axis=0)             # (3,128) f32
    return w_packed, b_packed


@functools.partial(jax.jit, static_argnames=("n_actions", "block_b"))
def dqn_forward(x, w_packed, b_packed, *, n_actions, block_b=256):
    """x: (B, n_obs) float32 -> (B, n_actions) float32."""
    B, n_obs = x.shape
    kernel = functools.partial(dqn_kernel, n_obs=n_obs)

    if B >= block_b:
        # Training-sized batch: 1-D grid over batch tiles; weights/biases stay
        # VMEM-resident (constant block index); batch axis is "parallel" so it
        # shards across both TensorCores on v7x.  Any batch size works: pad up
        # to a tile multiple (padded rows compute bias-only garbage, sliced off).
        num_blocks = pl.cdiv(B, block_b)
        b_padded = num_blocks * block_b
        x_in = jnp.pad(x, ((0, b_padded - B), (0, 0))) if b_padded != B else x
        out = pl.pallas_call(
            kernel,
            out_shape=jax.ShapeDtypeStruct((b_padded, HIDDEN), jnp.float32),
            grid=(num_blocks,),
            in_specs=[
                pl.BlockSpec((block_b, n_obs), lambda i: (i, 0)),
                pl.BlockSpec((3 * HIDDEN, HIDDEN), lambda i: (0, 0)),
                pl.BlockSpec((3, HIDDEN), lambda i: (0, 0)),
            ],
            out_specs=pl.BlockSpec((block_b, HIDDEN), lambda i: (i, 0)),
            compiler_params=pltpu.CompilerParams(
                dimension_semantics=("parallel",)),
        )(x_in, w_packed, b_packed)
    else:
        # Small-batch inference path: single invocation, everything in VMEM.
        vmem = pl.BlockSpec(memory_space=pltpu.MemorySpace.VMEM)
        out = pl.pallas_call(
            kernel,
            out_shape=jax.ShapeDtypeStruct((B, HIDDEN), jnp.float32),
            in_specs=[vmem, vmem, vmem],
            out_specs=vmem,
        )(x, w_packed, b_packed)

    return out[:B, :n_actions]


def init_params(key, n_observations, n_actions, hidden=HIDDEN):
    """Deterministic init mimicking PyTorch nn.Linear default (uniform +-1/sqrt(fan_in)).
    Weights stored transposed to (in, out); biases as (1, out)."""
    ks = jax.random.split(key, 6)

    def linear(kw, kb, fan_in, fan_out):
        bound = 1.0 / jnp.sqrt(fan_in)
        w = jax.random.uniform(kw, (fan_in, fan_out), jnp.float32, -bound, bound)
        b = jax.random.uniform(kb, (1, fan_out), jnp.float32, -bound, bound)
        return w, b

    w1, b1 = linear(ks[0], ks[1], n_observations, hidden)
    w2, b2 = linear(ks[2], ks[3], hidden, hidden)
    w3, b3 = linear(ks[4], ks[5], hidden, n_actions)
    return {"w1": w1, "b1": b1, "w2": w2, "b2": b2, "w3": w3, "b3": b3}


def dqn_reference(x, w_packed, b_packed, n_actions):
    """Pure-JAX reference with the same numerics as the kernel."""
    n_obs = x.shape[1]
    w1 = w_packed[0:n_obs, :].astype(jnp.float32)
    w2 = w_packed[1 * HIDDEN:2 * HIDDEN]
    w3 = w_packed[2 * HIDDEN:3 * HIDDEN]
    b1, b2, b3 = b_packed[0:1], b_packed[1:2], b_packed[2:3]

    h1 = b1 + x[:, 0:1] * w1[0:1, :]
    for k in range(1, n_obs):
        h1 = h1 + x[:, k:k + 1] * w1[k:k + 1, :]
    h1 = jnp.maximum(h1, 0.0).astype(jnp.bfloat16)
    h2 = jnp.maximum(
        jnp.dot(h1, w2, preferred_element_type=jnp.float32) + b2, 0.0
    ).astype(jnp.bfloat16)
    out = jnp.dot(h2, w3, preferred_element_type=jnp.float32) + b3
    return out[:, :n_actions]


if __name__ == "__main__":
    # CartPole-v1: observation dim = 4, action dim = 2.
    # TODO(synk): gym env / replay buffer / optimizer loop are outside the
    # forward pass and are not part of this kernel.
    n_observations, n_actions = 4, 2

    key = jax.random.PRNGKey(0)
    k_params, k_x_small, k_x_big = jax.random.split(key, 3)
    params = init_params(k_params, n_observations, n_actions)
    w_packed, b_packed = pack_params(params, n_observations, n_actions)

    # 1) Small-batch inference path (action selection / tutorial-sized batches).
    batch = 4
    x_small = jax.random.normal(k_x_small, (batch, n_observations), jnp.float32)
    out_small = jax.block_until_ready(
        dqn_forward(x_small, w_packed, b_packed, n_actions=n_actions))
    ref_small = dqn_reference(x_small, w_packed, b_packed, n_actions)
    assert out_small.shape == (batch, n_actions)
    assert jnp.allclose(out_small, ref_small, atol=1e-3, rtol=1e-3), "small-batch mismatch"

    # 2) Training-sized batch, NOT a multiple of the tile -> exercises the
    #    gridded path plus batch padding.
    big_batch = 640
    x_big = jax.random.normal(k_x_big, (big_batch, n_observations), jnp.float32)
    out_big = jax.block_until_ready(
        dqn_forward(x_big, w_packed, b_packed, n_actions=n_actions))
    ref_big = dqn_reference(x_big, w_packed, b_packed, n_actions)
    assert out_big.shape == (big_batch, n_actions)
    assert jnp.allclose(out_big, ref_big, atol=1e-3, rtol=1e-3), "big-batch mismatch"

    print("KERNEL_OK")
</pallas_src>

<mosaic_0001>
module attributes {stable_mosaic.version = 11 : i64} {
  func.func @dqn_kernel(%arg0: memref<4x4xf32, #tpu.memory_space<vmem>>, %arg1: memref<384x128xbf16, #tpu.memory_space<vmem>>, %arg2: memref<3x128xf32, #tpu.memory_space<vmem>>, %arg3: memref<4x128xf32, #tpu.memory_space<vmem>>) attributes {dimension_semantics = [], scalar_prefetch = 0 : i64, scratch_operands = 0 : i64, tpu.core_type = #tpu.core_type<tc>} {
    %c0 = arith.constant 0 : index
    %c0_0 = arith.constant 0 : index
    %0 = vector.load %arg0[%c0, %c0_0] : memref<4x4xf32, #tpu.memory_space<vmem>>, vector<4x4xf32>
    %c0_1 = arith.constant 0 : index
    %c0_2 = arith.constant 0 : index
    %1 = vector.load %arg1[%c0_1, %c0_2] : memref<384x128xbf16, #tpu.memory_space<vmem>>, vector<4x128xbf16>
    %2 = arith.extf %1 : vector<4x128xbf16> to vector<4x128xf32>
    %c128 = arith.constant 128 : index
    %c0_3 = arith.constant 0 : index
    %3 = vector.load %arg1[%c128, %c0_3] : memref<384x128xbf16, #tpu.memory_space<vmem>>, vector<128x128xbf16>
    %c256 = arith.constant 256 : index
    %c0_4 = arith.constant 0 : index
    %4 = vector.load %arg1[%c256, %c0_4] : memref<384x128xbf16, #tpu.memory_space<vmem>>, vector<128x128xbf16>
    %c0_5 = arith.constant 0 : index
    %c0_6 = arith.constant 0 : index
    %5 = vector.load %arg2[%c0_5, %c0_6] : memref<3x128xf32, #tpu.memory_space<vmem>>, vector<1x128xf32>
    %c1 = arith.constant 1 : index
    %c0_7 = arith.constant 0 : index
    %6 = vector.load %arg2[%c1, %c0_7] : memref<3x128xf32, #tpu.memory_space<vmem>>, vector<1x128xf32>
    %c2 = arith.constant 2 : index
    %c0_8 = arith.constant 0 : index
    %7 = vector.load %arg2[%c2, %c0_8] : memref<3x128xf32, #tpu.memory_space<vmem>>, vector<1x128xf32>
    %8 = vector.extract_strided_slice %0 {offsets = [0, 0], sizes = [4, 1], strides = [1, 1]} : vector<4x4xf32> to vector<4x1xf32>
    %9 = vector.extract_strided_slice %2 {offsets = [0, 0], sizes = [1, 128], strides = [1, 1]} : vector<4x128xf32> to vector<1x128xf32>
    %10 = vector.broadcast %8 : vector<4x1xf32> to vector<4x128xf32>
    %11 = vector.broadcast %9 : vector<1x128xf32> to vector<4x128xf32>
    %12 = arith.mulf %10, %11 : vector<4x128xf32>
    %13 = vector.broadcast %5 : vector<1x128xf32> to vector<4x128xf32>
    %14 = arith.addf %13, %12 : vector<4x128xf32>
    %15 = vector.extract_strided_slice %0 {offsets = [0, 1], sizes = [4, 1], strides = [1, 1]} : vector<4x4xf32> to vector<4x1xf32>
    %16 = vector.extract_strided_slice %2 {offsets = [1, 0], sizes = [1, 128], strides = [1, 1]} : vector<4x128xf32> to vector<1x128xf32>
    %17 = vector.broadcast %15 : vector<4x1xf32> to vector<4x128xf32>
    %18 = vector.broadcast %16 : vector<1x128xf32> to vector<4x128xf32>
    %19 = arith.mulf %17, %18 : vector<4x128xf32>
    %20 = arith.addf %14, %19 : vector<4x128xf32>
    %21 = vector.extract_strided_slice %0 {offsets = [0, 2], sizes = [4, 1], strides = [1, 1]} : vector<4x4xf32> to vector<4x1xf32>
    %22 = vector.extract_strided_slice %2 {offsets = [2, 0], sizes = [1, 128], strides = [1, 1]} : vector<4x128xf32> to vector<1x128xf32>
    %23 = vector.broadcast %21 : vector<4x1xf32> to vector<4x128xf32>
    %24 = vector.broadcast %22 : vector<1x128xf32> to vector<4x128xf32>
    %25 = arith.mulf %23, %24 : vector<4x128xf32>
    %26 = arith.addf %20, %25 : vector<4x128xf32>
    %27 = vector.extract_strided_slice %0 {offsets = [0, 3], sizes = [4, 1], strides = [1, 1]} : vector<4x4xf32> to vector<4x1xf32>
    %28 = vector.extract_strided_slice %2 {offsets = [3, 0], sizes = [1, 128], strides = [1, 1]} : vector<4x128xf32> to vector<1x128xf32>
    %29 = vector.broadcast %27 : vector<4x1xf32> to vector<4x128xf32>
    %30 = vector.broadcast %28 : vector<1x128xf32> to vector<4x128xf32>
    %31 = arith.mulf %29, %30 : vector<4x128xf32>
    %32 = arith.addf %26, %31 : vector<4x128xf32>
    %cst = arith.constant 0.000000e+00 : f32
    %33 = vector.broadcast %cst : f32 to vector<4x128xf32>
    %34 = arith.maximumf %32, %33 : vector<4x128xf32>
    %35 = arith.truncf %34 : vector<4x128xf32> to vector<4x128xbf16>
    %cst_9 = arith.constant dense<0.000000e+00> : vector<4x128xf32>
    %36 = tpu.matmul %35, %3, %cst_9 {dimension_numbers = #tpu.dot_dimension_numbers<[1], [0], [0], [1], [0, 0, 1, 1], [], []>} : vector<4x128xbf16>, vector<128x128xbf16>, vector<4x128xf32> -> vector<4x128xf32>
    %37 = vector.broadcast %6 : vector<1x128xf32> to vector<4x128xf32>
    %38 = arith.addf %36, %37 : vector<4x128xf32>
    %cst_10 = arith.constant 0.000000e+00 : f32
    %39 = vector.broadcast %cst_10 : f32 to vector<4x128xf32>
    %40 = arith.maximumf %38, %39 : vector<4x128xf32>
    %41 = arith.truncf %40 : vector<4x128xf32> to vector<4x128xbf16>
    %cst_11 = arith.constant dense<0.000000e+00> : vector<4x128xf32>
    %42 = tpu.matmul %41, %4, %cst_11 {dimension_numbers = #tpu.dot_dimension_numbers<[1], [0], [0], [1], [0, 0, 1, 1], [], []>} : vector<4x128xbf16>, vector<128x128xbf16>, vector<4x128xf32> -> vector<4x128xf32>
    %43 = vector.broadcast %7 : vector<1x128xf32> to vector<4x128xf32>
    %44 = arith.addf %42, %43 : vector<4x128xf32>
    %c0_12 = arith.constant 0 : index
    %c0_13 = arith.constant 0 : index
    %45 = vector.load %arg3[%c0_12, %c0_13] : memref<4x128xf32, #tpu.memory_space<vmem>>, vector<4x128xf32>
    tpu.vector_store %arg3[%c0_12, %c0_13], %44 {strides = array<i32>} : memref<4x128xf32, #tpu.memory_space<vmem>>, vector<4x128xf32>,
    return
  }
}

</mosaic_0001>

<bundles_post_ra>
// kernel: dqn_forward.1
= control target key start
LH: loop header
LB: loop body
LE: loop exit
PB: predicated region body
PF: predicated region fallthrough
CT: control target
= control target key end

     0   :  { %8 = vsyncpa [#allocation3], 0  ;;  %s566_s0 = inlined_call_operand.hbm [shape: f32[4,4], index: 0, kind: input, shape index: {}]   ;;  %s567_s1 = inlined_call_operand.hbm [shape: bf16[384,128], index: 1, kind: input, shape index: {}]   ;;  %s568_s2 = inlined_call_operand.vmem [shape: f32[3,128], index: 2, kind: input, shape index: {}]   ;;  %s569_s3 = inlined_call_operand.vmem [shape: f32[4,128], index: 3, kind: output, shape index: {}]  }
   0x1   :  { %9 = vsyncpa [#allocation5], 0  ;;  %s475_s12 = smov [#allocation2]   ;;  %s476_s14 = smov [#allocation4]  }
   0x2   :  { %s16_s13 = sshll.u32 %s475_s12, 4  ;;  %s25_s15 = sshll.u32 %s476_s14, 4  ;;  %s17_s13 = int_to_ptr.vmem [resolvable:$true] %s16_s13  ;;  %s505_s15 = int_to_ptr.vmem [resolvable:$true] %s25_s15 }
   0x3   :  { %s427_s18 = scalar_lea.hbm %s566_s0, 64 }
   0x4   :  { %p428_p0 = scmp.ne.s32.totalorder %s566_s0, %s427_s18  ;;  %p431_p1 = scmp.lt.u32.totalorder %s427_s18, %s566_s0 }
   0x6   :  { %p433_p2 = pnand %p431_p1, %p428_p0 }
   0x8   :  { %436 = shalt.err (!%p433_p2)
}
   0x9   :  { %s437_s23 = scalar_lea.vmem %s17_s13, 64  ;;  %p442_p4 = scmp.lt.s32.totalorder %s17_s13, %s17_s13 }
   0xa   :  { %p438_p3 = scmp.ne.s32.totalorder %s17_s13, %s437_s23  ;;  %p443_p5 = scmp.lt.s32.totalorder %s437_s23, %s437_s23 }
   0xc   :  { %p444_p6 = por %p443_p5, %p442_p4 }
   0xe   :  { %p445_p7 = pnand %p444_p6, %p438_p3 }
  0x10   :  { %448 = shalt.err (!%p445_p7)
}
  0x11   :  { %19 = dma.hbm_to_vmem [thread:$0]  %s566_s0, 64, %s17_s13, [#allocation3]  }
  0x12   :  { %s449_s28 = scalar_lea.hbm %s567_s1, 3072 }
  0x13   :  { %p450_p8 = scmp.ne.s32.totalorder %s567_s1, %s449_s28  ;;  %p453_p9 = scmp.lt.u32.totalorder %s449_s28, %s567_s1 }
  0x15   :  { %p455_p10 = pnand %p453_p9, %p450_p8 }
  0x17   :  { %458 = shalt.err (!%p455_p10)
}
  0x18   :  { %s459_s6 = scalar_lea.vmem %s505_s15, 3072  ;;  %p464_p12 = scmp.lt.s32.totalorder %s505_s15, %s505_s15 }
  0x19   :  { %p460_p11 = scmp.ne.s32.totalorder %s505_s15, %s459_s6  ;;  %p465_p13 = scmp.lt.s32.totalorder %s459_s6, %s459_s6 }
  0x1b   :  { %p466_p0 = por %p465_p13, %p464_p12 }
  0x1d   :  { %p467_p1 = pnand %p466_p0, %p460_p11 }
  0x1f   :  { %470 = shalt.err (!%p467_p1)
}
  0x20   :  { %s477_s0 = smov 64   ;;  %s478_s7 = smov 4  }
  0x21   :  { %31 = dma.hbm_to_vmem [thread:$0]  %s567_s1, 3072, %s505_s15, [#allocation5], %s477_s0, %s477_s0, %s478_s7  }
  0x22   :  { %471 = dma.done.wait [#allocation3], 64  }
  0x23   :  { %472 = vsyncadd [#allocation3], 4294967232 }
  0x24   :  { %473 = dma.done.wait [#allocation5], 3072  }
  0x25   :  { %474 = vsyncadd [#allocation5], 4294964224  ;;  %v479_v0 = vmov 0   ;;  %v480_v1 = vmov 2   ;;  %v481_v2 = vmov 0.0   ;;  %v411_v4 = vld [vmem:[#allocation4 + $0x40] sm:$0xff]   ;;  %v84_v20 = vlaneseq }
  0x26   :  { %406 = vset.pattern.permute.xlu0 %v479_v0  ;;  %408 = vset.pattern.permute.xlu1 %v480_v1  ;;  %v41_v3 = vld [vmem:[#allocation2] sm:$0xf]  ;;  %v412_v5 = vld [vmem:[#allocation4 + $0x48] sm:$0xff]   ;;  %v482_v6 = vmov 1   ;;  %v483_v7 = vmov 3   ;;  %v413_v8 = vld [vmem:[#allocation4 + $0x50] sm:$0xff]  }
  0x27   :  { %356 = vmatprep.subr.bf16.mxu0 %v481_v2  ;;  %376 = vmatprep.subr.bf16.mxu1 %v481_v2  ;;  %v414_v9 = vld [vmem:[#allocation4 + $0x58] sm:$0xff]   ;;  %v415_v10 = vld [vmem:[#allocation4 + $0x60] sm:$0xff]   ;;  %vm484_vm0 = vmmov 0   ;;  %v416_v12 = vld [vmem:[#allocation4 + $0x68] sm:$0xff]   ;;  %v85_v21 = vshrl.u32 %v84_v20, 7 }
  0x28   :  { %81 = vperm.xlu0 %406, %v41_v3   ;;  %105 = vperm.xlu1 %408, %v41_v3   ;;  %v419_v11 = vld [vmem:[#allocation4 + $0x80] sm:$0xff]   ;;  %v420_v13 = vld [vmem:[#allocation4 + $0x88] sm:$0xff]   ;;  %v417_v14 = vld [vmem:[#allocation4 + $0x70] sm:$0xff]  }
  0x29   :  { %357 = vmatpush3.bf16.msra.mxu0 %v411_v4  ;;  %372 = vmatprep.mubr.msk.bf16.mxu0 %vm484_vm0, %v481_v2  ;;  %v421_v15 = vld [vmem:[#allocation4 + $0x90] sm:$0xff]   ;;  %v418_v16 = vld [vmem:[#allocation4 + $0x78] sm:$0xff]   ;;  %v423_v18 = vld [vmem:[#allocation4 + $0xa0] sm:$0xff]   ;;  %v86_v24 = vsub.s32 0, %v85_v21  ;;  %v100_v26 = vsub.s32 1, %v85_v21  ;;  %v110_v28 = vsub.s32 2, %v85_v21 }
  0x2a   :  { %358 = vmatprep.subr.bf16.mxu0 %v481_v2  ;;  %392 = vmatprep.mubr.msk.bf16.mxu1 %vm484_vm0, %v481_v2  ;;  %v422_v17 = vld [vmem:[#allocation4 + $0x98] sm:$0xff]   ;;  %v424_v19 = vld [vmem:[#allocation4 + $0xa8] sm:$0xff]   ;;  %v42_v22 = vld [vmem:[#allocation4] sm:$0x3]  ;;  %v120_v30 = vsub.s32 3, %v85_v21 }
  0x2b   :  { %377 = vmatpush3.bf16.msra.mxu1 %v419_v11  ;;  %v43_v23 = vunpack.c.l.bf16 %v42_v22  ;;  %v319_v33 = vld [vmem:[%s568_s2] ss:$0 sm:$0xff]  ;;  %v425_v47 = vld [vmem:[#allocation4 + $0xb0] sm:$0xff]   ;;  %v320_v49 = vld [vmem:[%s568_s2 + $0x1] ss:$0 sm:$0xff] }
  0x2c   :  { %407 = vset.pattern.permute.xlu0 %v482_v6  ;;  %409 = vset.pattern.permute.xlu1 %v483_v7  ;;  %v426_v48 = vld [vmem:[#allocation4 + $0xb8] sm:$0xff]  }
  0x2d   :  { %95 = vperm.xlu0 %407, %v41_v3   ;;  %115 = vperm.xlu1 %409, %v41_v3   ;;  %v87_v25 = vrot.slane %v43_v23, %v86_v24  ;;  %v101_v32 = vrot.slane %v43_v23, %v100_v26  ;;  %v111_v34 = vrot.slane %v43_v23, %v110_v28  ;;  %v329_v57 = vld [vmem:[%s568_s2 + $0x2] ss:$0 sm:$0xff] }
  0x2e   :  { %359 = vmatpush3.bf16.msra.mxu0 %v412_v5  ;;  %378 = vmatprep.subr.bf16.mxu1 %v481_v2  ;;  %v121_v35 = vrot.slane %v43_v23, %v120_v30 }
  0x2f   :  { %360 = vmatprep.subr.bf16.mxu0 %v481_v2  ;;  %379 = vmatpush3.bf16.msra.mxu1 %v420_v13 }
  0x30   :  { %380 = vmatprep.subr.bf16.mxu1 %v481_v2 }
  0x31   :  { %410 = vset.pattern.permute.xlu0 %v483_v7 }
  0x32   :  { %361 = vmatpush3.bf16.msra.mxu0 %v413_v8 }
  0x33   :  { %362 = vmatprep.subr.bf16.mxu0 %v481_v2  ;;  %381 = vmatpush3.bf16.msra.mxu1 %v421_v15 }
  0x34   :  { %382 = vmatprep.subr.bf16.mxu1 %v481_v2 }
  0x36   :  { %363 = vmatpush3.bf16.msra.mxu0 %v414_v9 }
  0x37   :  { %364 = vmatprep.subr.bf16.mxu0 %v481_v2  ;;  %383 = vmatpush3.bf16.msra.mxu1 %v422_v17 }
  0x38   :  { %384 = vmatprep.subr.bf16.mxu1 %v481_v2 }
  0x3a   :  { %365 = vmatpush3.bf16.msra.mxu0 %v415_v10 }
  0x3b   :  { %366 = vmatprep.subr.bf16.mxu0 %v481_v2  ;;  %385 = vmatpush3.bf16.msra.mxu1 %v423_v18 }
  0x3c   :  { %386 = vmatprep.subr.bf16.mxu1 %v481_v2 }
  0x3e   :  { %367 = vmatpush3.bf16.msra.mxu0 %v416_v12 }
  0x3f   :  { %368 = vmatprep.subr.bf16.mxu0 %v481_v2  ;;  %387 = vmatpush3.bf16.msra.mxu1 %v424_v19 }
  0x40   :  { %388 = vmatprep.subr.bf16.mxu1 %v481_v2 }
  0x42   :  { %369 = vmatpush3.bf16.msra.mxu0 %v417_v14 }
  0x43   :  { %370 = vmatprep.subr.bf16.mxu0 %v481_v2  ;;  %389 = vmatpush3.bf16.msra.mxu1 %v425_v47 }
  0x44   :  { %390 = vmatprep.subr.bf16.mxu1 %v481_v2 }
  0x46   :  { %371 = vmatpush3.bf16.msra.mxu0 %v418_v16 }
  0x47   :  { %391 = vmatpush3.bf16.msra.mxu1 %v426_v48 }
  0xa7   :  { %v82_v27 = vpop.permute.xlu0 %81  ;;  %v106_v29 = vpop.permute.xlu1 %105 }
  0xa8   :  { %v88_v31 = vmul.f32 %v87_v25, %v82_v27  ;;  %v112_v40 = vmul.f32 %v111_v34, %v106_v29 }
  0xaa   :  { %v93_v38 = vadd.f32 %v319_v33, %v88_v31 }
  0xac   :  { %v96_v36 = vpop.permute.xlu0 %95  ;;  %v116_v37 = vpop.permute.xlu1 %115 }
  0xad   :  { %v102_v39 = vmul.f32 %v101_v32, %v96_v36  ;;  %v122_v42 = vmul.f32 %v121_v35, %v116_v37 }
  0xaf   :  { %v103_v41 = vadd.f32 %v102_v39, %v93_v38 }
  0xb1   :  { %v113_v43 = vadd.f32 %v112_v40, %v103_v41 }
  0xb3   :  { %v123_v44 = vadd.f32 %v122_v42, %v113_v43 }
  0xb5   :  { %v124_v45 = vmax.f32 %v123_v44, 0.0 }
  0xb7   :  { %v125_v46 = vpack.c.bf16 %v124_v45, %v124_v45 }
  0xb9   :  { %373 = vmatmul.mubr.bf16.vlgmr.msra.gmra.mrb[0].mxu0 %v125_v46 }
 0x18c   :  { %v212_v50 = vpop.f32.mrb[0].mxu0 }
 0x18d   :  { %v213_v51 = vadd.f32 %v320_v49, %v212_v50  ;;  %v374_v52 = vpop.f32.mrb[1].mxu0 }
 0x18e   :  { %v215_v53 = vpop.f32.mrb[2].mxu0 }
 0x18f   :  { %v218_v54 = vmax.f32 %v213_v51, 0.0  ;;  %v375_v55 = vpop.f32.mrb[3].mxu0 }
 0x191   :  { %v219_v56 = vpack.c.bf16 %v218_v54, %v218_v54 }
 0x193   :  { %393 = vmatmul.mubr.bf16.vlgmr.msra.gmra.mrb[0].mxu1 %v219_v56 }
 0x266   :  { %v306_v58 = vpop.f32.mrb[0].mxu1 }
 0x267   :  { %v307_v59 = vadd.f32 %v329_v57, %v306_v58  ;;  %v394_v60 = vpop.f32.mrb[1].mxu1 }
 0x268   :  { %v309_v61 = vpop.f32.mrb[2].mxu1 }
 0x269   :  { %312 = vst [vmem:[%s569_s3] sm:$0xf] %v307_v59  ;;  %v395_v62 = vpop.f32.mrb[3].mxu1 }
 0x26a   :  { %317 = vsyncpa [#allocation3], 1 }
 0x26b   :  { %318 = vsyncpa [#allocation5], 1 }

</bundles_post_ra>
